<compile_context>
chip_gen: v7x
topology: tpu7x:2x2x1
jax: 0.10.0
libtpu: 0.0.40
codegen_flags: <defaults>
</compile_context>

<pallas_src>
import math
import numpy as np
import jax
import jax.numpy as jnp
from jax.experimental import pallas as pl
from jax.experimental.pallas import tpu as pltpu


def _dct_filters(C, H, W, num_freq=2):
    # TODO(synk): DctCFea source was not provided in the module; implemented as
    # FcaNet-style multi-spectral DCT pooling with bnumfre=2 frequency groups.
    freqs = [(0, 0), (0, 1)][:num_freq]
    cpart = C // num_freq

    def basis(pos, freq, n):
        r = math.cos(math.pi * freq * (pos + 0.5) / n) / math.sqrt(n)
        return r * math.sqrt(2.0) if freq != 0 else r

    w = np.zeros((C, H, W), dtype=np.float32)
    for i, (u, v) in enumerate(freqs):
        c0 = i * cpart
        c1 = (i + 1) * cpart if i < num_freq - 1 else C
        for h in range(H):
            for q in range(W):
                w[c0:c1, h, q] = basis(h, u, H) * basis(q, v, W)
    return w


def scsp_kernel(x_ref, dctw_ref, cpar_ref, mpar_ref, convt_ref, w1t_ref,
                w2t_ref, out_ref):
    """One (bt, C, HW) batch tile, fully vectorized (no per-sample unroll)."""
    cp = cpar_ref[...]                       # (8, C) row-packed per-channel params
    mp = mpar_ref[...]                       # (8, mid)
    wmax, g1, bln1 = cp[0:1, :], cp[1:2, :], cp[2:3, :]
    b2, lcb = cp[3:4, :], cp[4:5, :]
    b1, g2, bln2 = mp[0:1, :], mp[1:2, :], mp[2:3, :]

    xb = x_ref[...]                          # (bt, C, HW), I/O dtype
    xf = xb.astype(jnp.float32)              # no-op for f32 inputs
    dctw = dctw_ref[...]                     # (C, HW) f32, wdct already folded in

    # --- channel pooling over spatial (memory-bound hot path) ---
    maxp = jnp.max(xf, axis=-1)                          # (bt, C)
    dctp = jnp.sum(xf * dctw[None, :, :], axis=-1)       # (bt, C)
    x_sc = wmax * maxp + dctp                            # (bt, C), C on lanes

    # --- Conv1d(1,1,k=3,pad=1) over channels as tridiagonal batched matmul ---
    # TODO(synk): for very large C the (C,C) constant could be replaced by a
    # pltpu.roll shifted-add to drop the C^2 VMEM resident.
    x_lc = jnp.dot(x_sc, convt_ref[...],
                   preferred_element_type=jnp.float32) + lcb

    # --- LayerNorm([C, 1]) over the channel (lane) axis ---
    v = x_sc + x_lc
    m = jnp.mean(v, axis=-1, keepdims=True)
    d = v - m
    var = jnp.mean(d * d, axis=-1, keepdims=True)
    y = d * jax.lax.rsqrt(var + 1e-5) * g1 + bln1        # (bt, C)

    # --- gct: 1x1 conv C->mid -> LayerNorm([mid,1,1]) -> ReLU -> 1x1 conv mid->C ---
    z = jnp.dot(y, w1t_ref[...], preferred_element_type=jnp.float32) + b1  # (bt, mid)
    m2 = jnp.mean(z, axis=-1, keepdims=True)
    d2 = z - m2
    var2 = jnp.mean(d2 * d2, axis=-1, keepdims=True)
    z = jnp.maximum(d2 * jax.lax.rsqrt(var2 + 1e-5) * g2 + bln2, 0.0)
    att = jnp.dot(z, w2t_ref[...], preferred_element_type=jnp.float32) + b2  # (bt, C)

    # --- residual broadcast add over all spatial positions ---
    out_ref[...] = (xf + att[:, :, None]).astype(out_ref.dtype)


def init_params(key, C, H, W, reduction=4):
    mid = max(1, int(C * (1.0 / reduction)))
    k = jax.random.split(key, 6)
    return dict(
        dct_w=jnp.asarray(_dct_filters(C, H, W, 2).reshape(C, H * W)),
        wmax=jnp.full((C,), 0.5, jnp.float32),       # nn.Parameter init 0.5
        wdct=jnp.full((C,), 0.5, jnp.float32),
        lc_w=jax.random.normal(k[0], (3,), jnp.float32) * 0.3,   # Conv1d(1,1,3)
        lc_b=jax.random.normal(k[1], (1,), jnp.float32) * 0.1,
        g1=jnp.ones((C,), jnp.float32),              # LayerNorm([C,1]) defaults
        bln1=jnp.zeros((C,), jnp.float32),
        w1=jax.random.normal(k[2], (mid, C), jnp.float32) / math.sqrt(C),
        b1=jax.random.normal(k[3], (mid,), jnp.float32) * 0.1,
        g2=jnp.ones((mid,), jnp.float32),            # LayerNorm([mid,1,1]) defaults
        bln2=jnp.zeros((mid,), jnp.float32),
        w2=jax.random.normal(k[4], (C, mid), jnp.float32) / math.sqrt(mid),
        b2=jnp.random.normal(k[5], (C,), jnp.float32) * 0.1 if False else
           jax.random.normal(k[5], (C,), jnp.float32) * 0.1,
    )


def _pack_params(P, C, mid):
    # Fold wdct into the DCT weights (linear in x), keep everything lane-major.
    dctw = (P['wdct'][:, None] * P['dct_w']).astype(jnp.float32)   # (C, HW)

    # Row-packed per-channel / per-mid parameter slabs (C / mid on the lane axis).
    cpar = jnp.zeros((8, C), jnp.float32)
    cpar = cpar.at[0].set(P['wmax'])
    cpar = cpar.at[1].set(P['g1'])
    cpar = cpar.at[2].set(P['bln1'])
    cpar = cpar.at[3].set(P['b2'])
    cpar = cpar.at[4].set(jnp.full((C,), P['lc_b'][0], jnp.float32))

    mpar = jnp.zeros((8, mid), jnp.float32)
    mpar = mpar.at[0].set(P['b1'])
    mpar = mpar.at[1].set(P['g2'])
    mpar = mpar.at[2].set(P['bln2'])

    # Tridiagonal (C, C) matrix equivalent of Conv1d(k=3, pad=1) over channels,
    # laid out so it right-multiplies the lane-major pooled tensor; rebuilt from
    # lc_w on EVERY forward so parameter updates reach the kernel.
    ci = jnp.arange(C)
    k = P['lc_w']
    convt = (k[0] * (ci[:, None] + 1 == ci[None, :])
             + k[1] * (ci[:, None] == ci[None, :])
             + k[2] * (ci[:, None] - 1 == ci[None, :])).astype(jnp.float32)

    w1t = P['w1'].astype(jnp.float32).T      # (C, mid)
    w2t = P['w2'].astype(jnp.float32).T      # (mid, C)
    return dctw, cpar, mpar, convt, w1t, w2t


def scsp_forward(x, P, *, max_batch_tile=32):
    B, C, H, W = x.shape
    HW = H * W
    mid = P['w1'].shape[0]
    orig_dtype = x.dtype

    # bf16 I/O stays bf16 end-to-end (halves HBM traffic); anything else runs f32.
    if x.dtype not in (jnp.float32, jnp.bfloat16):
        x = x.astype(jnp.float32)
    dtype = x.dtype
    itemsize = x.dtype.itemsize

    # No lane padding and no post-kernel slice: block dims equal the full (C, HW).
    x2 = x.reshape(B, C, HW)
    params = _pack_params(P, C, mid)
    param_bytes = sum(int(np.prod(p.shape)) * p.dtype.itemsize for p in params)

    # Generation-aware VMEM budget: ~80% of physical (v5e/v6e 128 MiB, v7x 64 MiB)
    # leaves headroom for compiler scratch.
    try:
        vmem_cap = int(pltpu.get_tpu_info().vmem_capacity_bytes)
    except Exception:
        vmem_cap = 64 * 1024 * 1024     # conservative default valid on all parts
    budget = int(vmem_cap * 0.8)

    # Per-sample VMEM per grid step: double-buffered x and out tiles plus f32
    # working temporaries inside the kernel (upcast copy + pooling product).
    io_block = C * HW * itemsize
    f32_block = C * HW * 4
    per_sample = 2 * 2 * io_block + 3 * f32_block
    bt_vmem = max(1, (budget - param_bytes - (2 << 20)) // per_sample)
    bt = int(max(1, min(B, max_batch_tile, bt_vmem)))
    # Keep >= 2 grid steps when possible so "parallel" shards the batch across
    # both TensorCores on megacore parts.
    if B > 1 and -(-B // bt) < 2:
        bt = -(-B // 2)
    grid = (pl.cdiv(B, bt),)
    # NOTE: when B % bt != 0 the last block contains garbage rows; rows are fully
    # independent and out-of-range rows are dropped on writeback.

    cost = pl.CostEstimate(
        flops=int(4 * B * C * HW + 2 * B * (C * C + 2 * C * mid)),
        transcendentals=int(2 * B),
        bytes_accessed=int(2 * B * C * HW * itemsize + param_bytes),
    )

    x_spec = pl.BlockSpec((bt, C, HW), lambda b: (b, 0, 0))
    out_spec = pl.BlockSpec((bt, C, HW), lambda b: (b, 0, 0))
    # Grid-invariant constants: whole-array, single-buffered VMEM residents
    # (no per-step DMA churn, no double-buffering).
    p_specs = [pl.BlockSpec(memory_space=pltpu.MemorySpace.VMEM) for _ in params]

    out = pl.pallas_call(
        scsp_kernel,
        out_shape=jax.ShapeDtypeStruct((B, C, HW), dtype),
        grid_spec=pltpu.PrefetchScalarGridSpec(
            num_scalar_prefetch=0,
            grid=grid,
            in_specs=[x_spec] + p_specs,
            out_specs=out_spec,
        ),
        compiler_params=pltpu.CompilerParams(
            dimension_semantics=("parallel",),
            vmem_limit_bytes=int(budget),
        ),
        cost_estimate=cost,
    )(x2, *params)

    return out.reshape(B, C, H, W).astype(orig_dtype)


def reference(x, P):
    # Pure-JAX mirror of the PyTorch forward, for verification.
    B, C, H, W = x.shape
    xf = x.reshape(B, C, H * W)
    maxp = jnp.max(xf, axis=-1)                                   # (B, C)
    dctp = jnp.sum(xf * P['dct_w'][None], axis=-1)                # (B, C)
    x_sc = P['wmax'][None] * maxp + P['wdct'][None] * dctp
    k = P['lc_w']
    pad = jnp.pad(x_sc, ((0, 0), (1, 1)))
    x_lc = k[0] * pad[:, :-2] + k[1] * pad[:, 1:-1] + k[2] * pad[:, 2:] + P['lc_b'][0]
    v = x_sc + x_lc
    m = jnp.mean(v, axis=1, keepdims=True)
    var = jnp.mean((v - m) ** 2, axis=1, keepdims=True)
    y = (v - m) / jnp.sqrt(var + 1e-5) * P['g1'][None] + P['bln1'][None]
    z = y @ P['w1'].T + P['b1'][None]
    m2 = jnp.mean(z, axis=1, keepdims=True)
    var2 = jnp.mean((z - m2) ** 2, axis=1, keepdims=True)
    z = jnp.maximum((z - m2) / jnp.sqrt(var2 + 1e-5) * P['g2'][None] + P['bln2'][None], 0.0)
    att = z @ P['w2'].T + P['b2'][None]
    return x + att[:, :, None, None]


if __name__ == "__main__":
    key = jax.random.PRNGKey(0)
    kx, kp = jax.random.split(key)
    B, C, H, W = 2, 8, 16, 16
    x = jax.random.normal(kx, (B, C, H, W), jnp.float32)
    params = init_params(kp, C, H, W, reduction=4)

    out = jax.block_until_ready(scsp_forward(x, params))
    ref = jax.block_until_ready(reference(x, params))

    assert out.shape == (B, C, H, W)
    np.testing.assert_allclose(np.asarray(out), np.asarray(ref), rtol=1e-4, atol=1e-4)
    print("KERNEL_OK")
</pallas_src>

<mosaic_0001>
module attributes {stable_mosaic.version = 11 : i64} {
  func.func @scsp_kernel(%arg0: i32, %arg1: memref<1x8x256xf32, #tpu.memory_space<vmem>>, %arg2: memref<8x256xf32, #tpu.memory_space<vmem>>, %arg3: memref<8x8xf32, #tpu.memory_space<vmem>>, %arg4: memref<8x2xf32, #tpu.memory_space<vmem>>, %arg5: memref<8x8xf32, #tpu.memory_space<vmem>>, %arg6: memref<8x2xf32, #tpu.memory_space<vmem>>, %arg7: memref<2x8xf32, #tpu.memory_space<vmem>>, %arg8: memref<1x8x256xf32, #tpu.memory_space<vmem>>) attributes {dimension_semantics = [#tpu.dimension_semantics<parallel>], iteration_bounds = array<i64: 2>, scalar_prefetch = 0 : i64, scratch_operands = 0 : i64, tpu.core_type = #tpu.core_type<tc>, window_params = [{transform_indices = @transform_0, window_bounds = array<i64: 1, 8, 256>}, {pipeline_mode = #tpu.pipeline_mode<synchronous>, transform_indices = @transform_1, window_bounds = array<i64: 8, 256>}, {pipeline_mode = #tpu.pipeline_mode<synchronous>, transform_indices = @transform_2, window_bounds = array<i64: 8, 8>}, {pipeline_mode = #tpu.pipeline_mode<synchronous>, transform_indices = @transform_3, window_bounds = array<i64: 8, 2>}, {pipeline_mode = #tpu.pipeline_mode<synchronous>, transform_indices = @transform_4, window_bounds = array<i64: 8, 8>}, {pipeline_mode = #tpu.pipeline_mode<synchronous>, transform_indices = @transform_5, window_bounds = array<i64: 8, 2>}, {pipeline_mode = #tpu.pipeline_mode<synchronous>, transform_indices = @transform_6, window_bounds = array<i64: 2, 8>}, {transform_indices = @transform_7, window_bounds = array<i64: 1, 8, 256>}]} {
    %c0 = arith.constant 0 : index
    %c0_0 = arith.constant 0 : index
    %0 = vector.load %arg3[%c0, %c0_0] : memref<8x8xf32, #tpu.memory_space<vmem>>, vector<8x8xf32>
    %c0_1 = arith.constant 0 : index
    %c0_2 = arith.constant 0 : index
    %1 = vector.load %arg4[%c0_1, %c0_2] : memref<8x2xf32, #tpu.memory_space<vmem>>, vector<8x2xf32>
    %2 = vector.extract_strided_slice %0 {offsets = [0, 0], sizes = [1, 8], strides = [1, 1]} : vector<8x8xf32> to vector<1x8xf32>
    %3 = vector.extract_strided_slice %0 {offsets = [1, 0], sizes = [1, 8], strides = [1, 1]} : vector<8x8xf32> to vector<1x8xf32>
    %4 = vector.extract_strided_slice %0 {offsets = [2, 0], sizes = [1, 8], strides = [1, 1]} : vector<8x8xf32> to vector<1x8xf32>
    %5 = vector.extract_strided_slice %0 {offsets = [3, 0], sizes = [1, 8], strides = [1, 1]} : vector<8x8xf32> to vector<1x8xf32>
    %6 = vector.extract_strided_slice %0 {offsets = [4, 0], sizes = [1, 8], strides = [1, 1]} : vector<8x8xf32> to vector<1x8xf32>
    %7 = vector.extract_strided_slice %1 {offsets = [0, 0], sizes = [1, 2], strides = [1, 1]} : vector<8x2xf32> to vector<1x2xf32>
    %8 = vector.extract_strided_slice %1 {offsets = [1, 0], sizes = [1, 2], strides = [1, 1]} : vector<8x2xf32> to vector<1x2xf32>
    %9 = vector.extract_strided_slice %1 {offsets = [2, 0], sizes = [1, 2], strides = [1, 1]} : vector<8x2xf32> to vector<1x2xf32>
    %c0_3 = arith.constant 0 : index
    %c0_4 = arith.constant 0 : index
    %c0_5 = arith.constant 0 : index
    %10 = vector.load %arg1[%c0_3, %c0_4, %c0_5] : memref<1x8x256xf32, #tpu.memory_space<vmem>>, vector<1x8x256xf32>
    %c0_6 = arith.constant 0 : index
    %c0_7 = arith.constant 0 : index
    %11 = vector.load %arg2[%c0_6, %c0_7] : memref<8x256xf32, #tpu.memory_space<vmem>>, vector<8x256xf32>
    %cst = arith.constant dense<0xFF800000> : vector<1x8xf32>
    %12 = vector.multi_reduction <maximumf>, %10, %cst [2] : vector<1x8x256xf32> to vector<1x8xf32>
    %13 = vector.shape_cast %11 : vector<8x256xf32> to vector<1x8x256xf32>
    %14 = arith.mulf %10, %13 : vector<1x8x256xf32>
    %cst_8 = arith.constant dense<0.000000e+00> : vector<1x8xf32>
    %15 = vector.multi_reduction <add>, %14, %cst_8 [2] : vector<1x8x256xf32> to vector<1x8xf32>
    %16 = arith.mulf %2, %12 : vector<1x8xf32>
    %17 = arith.addf %16, %15 : vector<1x8xf32>
    %c0_9 = arith.constant 0 : index
    %c0_10 = arith.constant 0 : index
    %18 = vector.load %arg5[%c0_9, %c0_10] : memref<8x8xf32, #tpu.memory_space<vmem>>, vector<8x8xf32>
    %cst_11 = arith.constant dense<0.000000e+00> : vector<1x8xf32>
    %19 = tpu.matmul %17, %18, %cst_11 {dimension_numbers = #tpu.dot_dimension_numbers<[1], [0], [0], [1], [0, 0, 1, 1], [], []>} : vector<1x8xf32>, vector<8x8xf32>, vector<1x8xf32> -> vector<1x8xf32>
    %20 = arith.addf %19, %6 : vector<1x8xf32>
    %21 = arith.addf %17, %20 : vector<1x8xf32>
    %cst_12 = arith.constant dense<0.000000e+00> : vector<1xf32>
    %22 = vector.multi_reduction <add>, %21, %cst_12 [1] : vector<1x8xf32> to vector<1xf32>
    %23 = vector.shape_cast %22 : vector<1xf32> to vector<1x1xf32>
    %cst_13 = arith.constant 8.000000e+00 : f32
    %24 = vector.broadcast %cst_13 : f32 to vector<1x1xf32>
    %25 = arith.divf %23, %24 : vector<1x1xf32>
    %26 = vector.broadcast %25 : vector<1x1xf32> to vector<1x8xf32>
    %27 = arith.subf %21, %26 : vector<1x8xf32>
    %28 = arith.mulf %27, %27 : vector<1x8xf32>
    %cst_14 = arith.constant dense<0.000000e+00> : vector<1xf32>
    %29 = vector.multi_reduction <add>, %28, %cst_14 [1] : vector<1x8xf32> to vector<1xf32>
    %30 = vector.shape_cast %29 : vector<1xf32> to vector<1x1xf32>
    %cst_15 = arith.constant 8.000000e+00 : f32
    %31 = vector.broadcast %cst_15 : f32 to vector<1x1xf32>
    %32 = arith.divf %30, %31 : vector<1x1xf32>
    %cst_16 = arith.constant 9.99999974E-6 : f32
    %33 = vector.broadcast %cst_16 : f32 to vector<1x1xf32>
    %34 = arith.addf %32, %33 : vector<1x1xf32>
    %35 = math.rsqrt %34 : vector<1x1xf32>
    %36 = vector.broadcast %35 : vector<1x1xf32> to vector<1x8xf32>
    %37 = arith.mulf %27, %36 : vector<1x8xf32>
    %38 = arith.mulf %37, %3 : vector<1x8xf32>
    %39 = arith.addf %38, %4 : vector<1x8xf32>
    %c0_17 = arith.constant 0 : index
    %c0_18 = arith.constant 0 : index
    %40 = vector.load %arg6[%c0_17, %c0_18] : memref<8x2xf32, #tpu.memory_space<vmem>>, vector<8x2xf32>
    %cst_19 = arith.constant dense<0.000000e+00> : vector<1x2xf32>
    %41 = tpu.matmul %39, %40, %cst_19 {dimension_numbers = #tpu.dot_dimension_numbers<[1], [0], [0], [1], [0, 0, 1, 1], [], []>} : vector<1x8xf32>, vector<8x2xf32>, vector<1x2xf32> -> vector<1x2xf32>
    %42 = arith.addf %41, %7 : vector<1x2xf32>
    %cst_20 = arith.constant dense<0.000000e+00> : vector<1xf32>
    %43 = vector.multi_reduction <add>, %42, %cst_20 [1] : vector<1x2xf32> to vector<1xf32>
    %44 = vector.shape_cast %43 : vector<1xf32> to vector<1x1xf32>
    %cst_21 = arith.constant 2.000000e+00 : f32
    %45 = vector.broadcast %cst_21 : f32 to vector<1x1xf32>
    %46 = arith.divf %44, %45 : vector<1x1xf32>
    %47 = vector.broadcast %46 : vector<1x1xf32> to vector<1x2xf32>
    %48 = arith.subf %42, %47 : vector<1x2xf32>
    %49 = arith.mulf %48, %48 : vector<1x2xf32>
    %cst_22 = arith.constant dense<0.000000e+00> : vector<1xf32>
    %50 = vector.multi_reduction <add>, %49, %cst_22 [1] : vector<1x2xf32> to vector<1xf32>
    %51 = vector.shape_cast %50 : vector<1xf32> to vector<1x1xf32>
    %cst_23 = arith.constant 2.000000e+00 : f32
    %52 = vector.broadcast %cst_23 : f32 to vector<1x1xf32>
    %53 = arith.divf %51, %52 : vector<1x1xf32>
    %cst_24 = arith.constant 9.99999974E-6 : f32
    %54 = vector.broadcast %cst_24 : f32 to vector<1x1xf32>
    %55 = arith.addf %53, %54 : vector<1x1xf32>
    %56 = math.rsqrt %55 : vector<1x1xf32>
    %57 = vector.broadcast %56 : vector<1x1xf32> to vector<1x2xf32>
    %58 = arith.mulf %48, %57 : vector<1x2xf32>
    %59 = arith.mulf %58, %8 : vector<1x2xf32>
    %60 = arith.addf %59, %9 : vector<1x2xf32>
    %cst_25 = arith.constant 0.000000e+00 : f32
    %61 = vector.broadcast %cst_25 : f32 to vector<1x2xf32>
    %62 = arith.maximumf %60, %61 : vector<1x2xf32>
    %c0_26 = arith.constant 0 : index
    %c0_27 = arith.constant 0 : index
    %63 = vector.load %arg7[%c0_26, %c0_27] : memref<2x8xf32, #tpu.memory_space<vmem>>, vector<2x8xf32>
    %cst_28 = arith.constant dense<0.000000e+00> : vector<1x8xf32>
    %64 = tpu.matmul %62, %63, %cst_28 {dimension_numbers = #tpu.dot_dimension_numbers<[1], [0], [0], [1], [0, 0, 1, 1], [], []>} : vector<1x2xf32>, vector<2x8xf32>, vector<1x8xf32> -> vector<1x8xf32>
    %65 = arith.addf %64, %5 : vector<1x8xf32>
    %66 = vector.shape_cast %65 : vector<1x8xf32> to vector<1x8x1xf32>
    %67 = vector.broadcast %66 : vector<1x8x1xf32> to vector<1x8x256xf32>
    %68 = arith.addf %10, %67 : vector<1x8x256xf32>
    %c0_29 = arith.constant 0 : index
    %c0_30 = arith.constant 0 : index
    %c0_31 = arith.constant 0 : index
    %69 = vector.load %arg8[%c0_29, %c0_30, %c0_31] : memref<1x8x256xf32, #tpu.memory_space<vmem>>, vector<1x8x256xf32>
    tpu.vector_store %arg8[%c0_29, %c0_30, %c0_31], %68 {strides = array<i32>} : memref<1x8x256xf32, #tpu.memory_space<vmem>>, vector<1x8x256xf32>,
    return
  }
  func.func @transform_0(%arg0: i32) -> (i32, i32, i32) {
    %c0_i32 = arith.constant 0 : i32
    %c0_i32_0 = arith.constant 0 : i32
    %c0_i32_1 = arith.constant 0 : i32
    return %arg0, %c0_i32, %c0_i32_0 : i32, i32, i32
  }
  func.func @transform_1(%arg0: i32) -> (i32, i32) {
    %c0_i32 = arith.constant 0 : i32
    %c0_i32_0 = arith.constant 0 : i32
    %c0_i32_1 = arith.constant 0 : i32
    return %c0_i32, %c0_i32_0 : i32, i32
  }
  func.func @transform_2(%arg0: i32) -> (i32, i32) {
    %c0_i32 = arith.constant 0 : i32
    %c0_i32_0 = arith.constant 0 : i32
    %c0_i32_1 = arith.constant 0 : i32
    return %c0_i32, %c0_i32_0 : i32, i32
  }
  func.func @transform_3(%arg0: i32) -> (i32, i32) {
    %c0_i32 = arith.constant 0 : i32
    %c0_i32_0 = arith.constant 0 : i32
    %c0_i32_1 = arith.constant 0 : i32
    return %c0_i32, %c0_i32_0 : i32, i32
  }
  func.func @transform_4(%arg0: i32) -> (i32, i32) {
    %c0_i32 = arith.constant 0 : i32
    %c0_i32_0 = arith.constant 0 : i32
    %c0_i32_1 = arith.constant 0 : i32
    return %c0_i32, %c0_i32_0 : i32, i32
  }
  func.func @transform_5(%arg0: i32) -> (i32, i32) {
    %c0_i32 = arith.constant 0 : i32
    %c0_i32_0 = arith.constant 0 : i32
    %c0_i32_1 = arith.constant 0 : i32
    return %c0_i32, %c0_i32_0 : i32, i32
  }
  func.func @transform_6(%arg0: i32) -> (i32, i32) {
    %c0_i32 = arith.constant 0 : i32
    %c0_i32_0 = arith.constant 0 : i32
    %c0_i32_1 = arith.constant 0 : i32
    return %c0_i32, %c0_i32_0 : i32, i32
  }
  func.func @transform_7(%arg0: i32) -> (i32, i32, i32) {
    %c0_i32 = arith.constant 0 : i32
    %c0_i32_0 = arith.constant 0 : i32
    %c0_i32_1 = arith.constant 0 : i32
    return %arg0, %c0_i32, %c0_i32_0 : i32, i32, i32
  }
}

</mosaic_0001>

<bundles_post_ra>
// kernel: tpu_custom_call.1
= control target key start
LH: loop header
LB: loop body
LE: loop exit
PB: predicated region body
PF: predicated region fallthrough
CT: control target
= control target key end

     0   :  { %12 = vsyncpa [#allocation3], 0  ;;  %s1146_s0 = inlined_call_operand.hbm [shape: f32[2,8,256], index: 0, kind: input, shape index: {}]   ;;  %s1147_s1 = inlined_call_operand.vmem [shape: f32[8,256], index: 1, kind: input, shape index: {}]   ;;  %s1148_s2 = inlined_call_operand.vmem [shape: f32[8,8], index: 2, kind: input, shape index: {}]   ;;  %s1149_s3 = inlined_call_operand.vmem [shape: f32[8,2], index: 3, kind: input, shape index: {}]   ;;  %s1150_s4 = inlined_call_operand.vmem [shape: f32[8,8], index: 4, kind: input, shape index: {}]   ;;  %s1151_s5 = inlined_call_operand.vmem [shape: f32[8,2], index: 5, kind: input, shape index: {}]   ;;  %s1152_s6 = inlined_call_operand.vmem [shape: f32[2,8], index: 6, kind: input, shape index: {}]   ;;  %s1153_s7 = inlined_call_operand.hbm [shape: f32[2,8,256], index: 7, kind: output, shape index: {}]  }
   0x1   :  { %14 = vsyncpa [#allocation3 + $0x1], 0 }
   0x2   :  { %15 = vsyncpa [#allocation4], 0 }
   0x3   :  { %17 = vsyncpa [#allocation4 + $0x1], 0  ;;  %s934_s24 = smov 0   ;;  %s936_s25 = smov 0  }
   0x4   :  { %s938_s26 = smov 0   ;;  %s940_s27 = smov 0  }
   0x5 LB: > { %s955_s28 = sadd.s32 4294967295, %s888_s27   ;;  %s699_s29 = sadd.s32 4294967294, %s888_s27   ;;  %s888_s27 = sphi %s940_s27, %s1168_s27   ;;  %s884_s26 = sphi %s938_s26, %s1167_s26   ;;  %s880_s25 = sphi %s936_s25, %s1166_s25   ;;  %s876_s24 = sphi %s934_s24, %s1165_s24  }
   0x6   : > { %s959_s30 = sadd.s32 1, %s888_s27   ;;  %s30_s8 = sadd.s32 1, %s884_s26 }
   0x7   : > { %s27_s9 = ssub.s32 %s888_s27, %s959_s30  ;;  %p37_p0 = scmp.ne.s32.totalorder %s884_s26, %s880_s25 }
   0x8   : > { %p28_p1 = scmp.eq.s32.totalorder %s27_s9, 0  ;;  %p38_p2 = scmp.eq.s32.totalorder %s888_s27, 0 }
   0x9   : > { %p43_p3 = scmp.ne.s32.totalorder %s880_s25, %s876_s24  ;;  %p44_p4 = scmp.eq.s32.totalorder %s955_s28, 0 }
   0xa   : > { %s971_s10 = scalar_select %p28_p1, %s884_s26, %s30_s8  }
   0xb   : > { %p973_p5 = por %p38_p2, %p37_p0  ;;  %p977_p6 = por %p44_p4, %p43_p3 }
   0xc   : > { %p193_p7 = scmp.eq.s32.totalorder %s955_s28, 1  ;;  %p199_p8 = scmp.eq.s32.totalorder %s699_s29, 1 }
   0xd   : > { %p752_p10 = scmp.lt.s32.totalorder %s888_s27, 2  ;;  %s237_s15 = sand.u32 1, %s884_s26  }
   0xe   : > { %p984_p11 = por %p193_p7, %p37_p0  ;;  %p988_p12 = por %p199_p8, %p43_p3 }
   0xf   : > { %s717_s16 = sshll.u32 %s888_s27, 8  ;;  %s702_s17 = sshll.u32 %s237_s15, 4 }
  0x10   : > { %s1157_s13 = scalar_select %p984_p11, 1, 0 }
  0x11   : > { %s1158_s14 = scalar_select %p988_p12, 1, 0 }
  0x12   : > { %s997_s20 = scalar_lea.hbm %s1146_s0, %s717_s16  ;;  %s241_s21 = scalar_lea.vmem [#allocation2], %s702_s17 }
  0x13   : > { %s249_s22 = sshll.u32 %s241_s21, 4  ;;  %p1001_p13 = pnand %p752_p10, %p973_p5  ;;  %s1005_s22 = int_to_ptr.vmem [resolvable:$true] %s249_s22 }
  0x14   : > { %s238_s29 = scalar_lea.sflag [#allocation3], %s237_s15  ;;  %s792_s8 = scalar_lea.hbm %s997_s20, 256 }
  0x15   : > { %p793_p2 = scmp.ne.s32.totalorder %s997_s20, %s792_s8  ;;  %p794_p3 = pneg %p1001_p13 }
  0x16   : > { %s797_s16 = scalar_lea.hbm %s1146_s0, 512  ;;  %p798_p5 = scmp.lt.u32.totalorder %s997_s20, %s1146_s0 }
  0x17   : > { %p795_p4 = pnand %p794_p3, %p793_p2  ;;  %p799_p8 = scmp.lt.u32.totalorder %s797_s16, %s792_s8 }
  0x18   : > { %p801_p9 = scmp.lt.u32.totalorder %s792_s8, %s997_s20 }
  0x19   : > { %p796_p7 = pneg %p795_p4  ;;  %p800_p10 = por %p799_p8, %p798_p5 }
  0x1b   : > { %p802_p0 = por %p801_p9, %p800_p10 }
  0x1d   : > { %p803_p1 = pnand %p802_p0, %p796_p7 }
  0x1f   : > { %806 = shalt.err (!%p803_p1)
}
  0x20   : > { %s807_s15 = scalar_lea.vmem %s1005_s22, 256  ;;  %s890_s19 = smov [#allocation2]  }
  0x21   : > { %p808_p2 = scmp.ne.s32.totalorder %s1005_s22, %s807_s15  ;;  %s812_s21 = sshll.u32 %s890_s19, 4  ;;  %s813_s21 = int_to_ptr.vmem [resolvable:$false] %s812_s21 }
  0x22   : > { %s814_s9 = scalar_lea.vmem %s813_s21, 512  ;;  %p815_p11 = scmp.lt.s32.totalorder %s1005_s22, %s813_s21 }
  0x23   : > { %p810_p4 = pnand %p808_p2, %p794_p3  ;;  %p816_p5 = scmp.lt.s32.totalorder %s814_s9, %s807_s15 }
  0x25   : > { %p811_p12 = pneg %p810_p4  ;;  %p817_p8 = por %p816_p5, %p815_p11 }
  0x27   : > { %p818_p9 = pnand %p817_p8, %p811_p12 }
  0x29   : > { %821 = shalt.err (!%p818_p9)
}
  0x2a   : > { %747 = dma.hbm_to_vmem [thread:$0]  (!%p1001_p13), %s997_s20, 256, %s1005_s22, %s238_s29  }
  0x2b   : > { %p1160_p0 = scmp.lt.s32.totalorder %s888_s27, 3  ;;  %p1161_p1 = scmp.ge.s32.totalorder %s888_s27, 1 }
  0x2d   : > { %p255_p3 = pnand %p1161_p1, %p1160_p0 }
  0x2e   : > { %s1039_s8 = sand.u32 (!%p255_p3), 1, %s880_s25  }
  0x2f   : > { %258 = sbr.rel (%p255_p3) target bundleno = 1613 (0x64d), region = 48  ;;  %s706_s11 = sshll.u32 (!%p255_p3), %s1039_s8, 4 }
  0x30   : > { %s261_s16 = scalar_lea.sflag (!%p255_p3), [#allocation3], %s1039_s8  ;;  %s264_s23 = scalar_lea.vmem (!%p255_p3), [#allocation2], %s706_s11 }
  0x36   : > { %867 = dma.done.wait (%p977_p6), %s261_s16, 256  }
  0x37   : > { %869 = vsyncadd (%p977_p6), %s261_s16, 4294967040  ;;  %v1049_v0 = vld [vmem:[%s264_s23] sm:$0xff]  ;;  %v1051_v1 = vld [vmem:[%s264_s23 + $0x8] sm:$0xff]  ;;  %v891_v8 = vmov 0.0   ;;  %vm892_vm0 = vmmov 0   ;;  %v310_v10 = vlaneseq  ;;  %vm329_vm1 = vcmask 64512  }
  0x38   : > { %v299_v2 = vld [vmem:[%s1147_s1] sm:$0xff]  ;;  %v301_v3 = vmax.f32 %v1049_v0, %v1051_v1  ;;  %v300_v4 = vld [vmem:[%s1147_s1 + $0x8] sm:$0xff]  ;;  %725 = vmatprep.subr.mxu0 %v891_v8  ;;  %730 = vmatprep.subr.mxu1 %v891_v8  ;;  %vm404_vm2 = vcmask 57344   ;;  %vm499_vm3 = vcmask 8192   ;;  %vm529_vm4 = vcmask 1041408   ;;  %s718_s29 = sshll.u32 %s955_s28, 8 }
  0x39   : > { %v304_v5 = vmul.f32 %v299_v2, %v1049_v0  ;;  %v305_v6 = vmul.f32 %v300_v4, %v1051_v1  ;;  %v325_v9 = vld [vmem:[%s1150_s4] sm:$0xff]  ;;  %727 = vmatprep.mubr.msk.f32.mxu0 %vm892_vm0, %v891_v8  ;;  %732 = vmatprep.mubr.msk.f32.mxu1 %vm892_vm0, %v891_v8  ;;  %v311_v11 = vand.u32 127, %v310_v10  ;;  %v1068_v12 = vshrl.u32 %v310_v10, 7  ;;  %s294_s17 = scalar_lea.vmem [#allocation5], %s706_s11  ;;  %s1102_s19 = scalar_lea.hbm %s1153_s7, %s718_s29 }
  0x3a   : > { %302 = vmax.xlane.f32.xlu0 %v301_v3  ;;  %726 = vmatpush3.msra.mxu0 %v325_v9  ;;  %v1074_v16 = vld [vmem:[%s1148_s2] sm:$0xff]  ;;  %vm525_vm5 = vcmask 15360   ;;  %s629_s12 = sshll.u32 %s294_s17, 4  ;;  %s615_s28 = scalar_lea.sflag [#allocation4], %s1039_s8  ;;  %s1104_s12 = int_to_ptr.vmem [resolvable:$true] %s629_s12 }
  0x3b   : > { %v306_v7 = vadd.f32 %v305_v6, %v304_v5  ;;  %735 = vmatprep.subr.mxu0 %v891_v8  ;;  %v314_v13 = vsub.s32 %v311_v11, %v1068_v12  ;;  %v327_v21 = vrot.slane %v1074_v16, 4  ;;  %v425_v32 = vld [vmem:[%s1151_s5] sm:$0xff]  ;;  %v419_v36 = vrot.slane %v1074_v16, 1  ;;  %s822_s11 = scalar_lea.vmem %s1104_s12, 256  ;;  %p1162_p11 = scmp.ne.s32.totalorder %s1157_s13, 0 }
  0x3c   : > { %731 = vmatpush3.msra.mxu1 %v425_v32  ;;  %v422_v39 = vrot.slane %v1074_v16, 2  ;;  %v296_v42 = vld [vmem:[%s1149_s3] sm:$0xff]  ;;  %v523_v63 = vrot.slane %v1074_v16, 3  ;;  %v605_v2 = vsub.s32 0, %v1068_v12  ;;  %p823_p6 = scmp.ne.s32.totalorder %s1104_s12, %s822_s11  ;;  %s893_s21 = smov [#allocation5]  }
  0x3d   : > { %v522_v52 = vld [vmem:[%s1152_s6] sm:$0x3]  ;;  %v515_v56 = vrot.slane %v296_v42, 1  ;;  %v518_v58 = vrot.slane %v296_v42, 2  ;;  %s826_s9 = sshll.u32 %s893_s21, 4  ;;  %s827_s9 = int_to_ptr.vmem [resolvable:$false] %s826_s9 }
  0x3e   : > { %307 = vadd.xlane.f32.xlu0 %v306_v7  ;;  %p824_p12 = pnand %p823_p6, %p1162_p11  ;;  %s828_s16 = scalar_lea.vmem %s827_s9, 512 }
  0x3f   : > { %p829_p7 = scmp.lt.s32.totalorder %s1104_s12, %s827_s9  ;;  %p830_p10 = scmp.lt.s32.totalorder %s828_s16, %s822_s11 }
  0x40   : > { %p825_p13 = pneg %p824_p12 }
  0x41   : > { %p831_p2 = por %p830_p10, %p829_p7 }
  0x43   : > { %p832_p4 = pnand %p831_p2, %p825_p13 }
  0xc7   : > { %v303_v14 = vpop.xlane.xlu0 %302 }
  0xc8   : > { %v315_v15 = vrot.slane %v303_v14, %v314_v13 }
  0xca   : > { %v317_v18 = vmul.f32 %v315_v15, %v1074_v16 }
  0xcb   : > { %v308_v17 = vpop.xlane.xlu0 %307 }
  0xcc   : > { %v322_v19 = vrot.slane %v308_v17, %v314_v13 }
  0xce   : > { %v324_v20 = vadd.f32 %v322_v19, %v317_v18 }
  0xd0   : > { %728 = vmatmul.mubr.msk.f32.vlgmr.msra.gmra.mrb[0].mxu0 %vm329_vm1, %v324_v20 }
  0xd1   : > { %737 = vmatprep.mubr.msk.f32.mxu0 %vm892_vm0, %v891_v8  ;;  %736 = vmatpush3.msk.msra.mxu0 %vm529_vm4, %v522_v52 }
 0x1a3   : > { %v399_v22 = vpop.f32.mrb[0].mxu0 }
 0x1a4   : > { %v400_v23 = vadd.f32 %v399_v22, %v327_v21  ;;  %v729_v24 = vpop.f32.mrb[1].mxu0 }
 0x1a6   : > { %v403_v25 = vadd.f32 %v400_v23, %v324_v20 }
 0x1a8   : > { %v405_v26 = vsel %vm404_vm2, %v403_v25, 0.0 }
 0x1a9   : > { %406 = vadd.xlane.f32.xlu1 %v405_v26 }
 0x236   : > { %v407_v27 = vpop.xlane.xlu1 %406 }
 0x237   : > { %v409_v28 = vmul.f32 0.125, %v407_v27 }
 0x239   : > { %v410_v29 = vsub.f32 %v403_v25, %v409_v28 }
 0x23b   : > { %v411_v30 = vmul.f32 %v410_v29, %v410_v29 }
 0x23d   : > { %v412_v31 = vsel %vm404_vm2, %v411_v30, 0.0 }
 0x23e   : > { %413 = vadd.xlane.f32.xlu1 %v412_v31 }
 0x2cb   : > { %v414_v33 = vpop.xlane.xlu1 %413 }
 0x2cc   : > { %v415_v34 = vmul.f32 0.125, %v414_v33 }
 0x2ce   : > { %v416_v35 = vadd.f32 1e-05, %v415_v34 }
 0x2d0   : > { %788 = vrsqrt.f32 %v416_v35 }
 0x2da   : > { %v789_v37 = vpop.eup %788 }
 0x2db   : > { %v418_v38 = vmul.f32 %v789_v37, %v410_v29 }
 0x2dd   : > { %v421_v40 = vmul.f32 %v419_v36, %v418_v38 }
 0x2df   : > { %v424_v41 = vadd.f32 %v422_v39, %v421_v40 }
 0x2e1   : > { %733 = vmatmul.mubr.msk.f32.vlgmr.msra.gmra.mrb[0].mxu1 %vm329_vm1, %v424_v41 }
 0x3b4   : > { %v495_v43 = vpop.f32.mrb[0].mxu1 }
 0x3b5   : > { %v496_v44 = vadd.f32 %v495_v43, %v296_v42  ;;  %v734_v45 = vpop.f32.mrb[1].mxu1 }
 0x3b7   : > { %v500_v46 = vsel %vm499_vm3, %v496_v44, 0.0 }
 0x3b8   : > { %501 = vadd.xlane.f32.xlu0 %v500_v46 }
 0x445   : > { %v502_v47 = vpop.xlane.xlu0 %501 }
 0x446   : > { %v504_v48 = vmul.f32 0.5, %v502_v47 }
 0x448   : > { %v505_v49 = vsub.f32 %v496_v44, %v504_v48 }
 0x44a   : > { %v506_v50 = vmul.f32 %v505_v49, %v505_v49 }
 0x44c   : > { %v507_v51 = vsel %vm499_vm3, %v506_v50, 0.0 }
 0x44d   : > { %508 = vadd.xlane.f32.xlu1 %v507_v51 }
 0x4da   : > { %v509_v53 = vpop.xlane.xlu1 %508 }
 0x4db   : > { %v510_v54 = vmul.f32 0.5, %v509_v53 }
 0x4dd   : > { %v511_v55 = vadd.f32 1e-05, %v510_v54 }
 0x4df   : > { %790 = vrsqrt.f32 %v511_v55 }
 0x4e9   : > { %v791_v57 = vpop.eup %790 }
 0x4ea   : > { %v513_v59 = vmul.f32 %v791_v57, %v505_v49 }
 0x4ec   : > { %v517_v60 = vmul.f32 %v515_v56, %v513_v59 }
 0x4ee   : > { %v520_v61 = vadd.f32 %v518_v58, %v517_v60 }
 0x4f0   : > { %v521_v62 = vmax.f32 %v520_v61, 0.0 }
 0x4f2   : > { %738 = vmatmul.mubr.msk.f32.vlgmr.msra.gmra.mrb[2].mxu0 %vm525_vm5, %v521_v62 }
 0x5c5   : > { %v599_v3 = vpop.f32.mrb[2].mxu0 }
 0x5c6   : > { %v600_v4 = vadd.f32 %v599_v3, %v523_v63  ;;  %v739_v5 = vpop.f32.mrb[3].mxu0 }
 0x5c8   : > { %v606_v6 = vrot.slane %v600_v4, %v605_v2 }
 0x5ca   : > { %608 = vbcast.lane.b32.xlu0 %v606_v6, 256 }
 0x63c   : > { %v609_v7 = vpop.permute.xlu0 %608 }
 0x63d   : > { %v610_v8 = vadd.f32 %v609_v7, %v1049_v0  ;;  %v611_v9 = vadd.f32 %v609_v7, %v1051_v1 }
 0x63f   : > { %612 = vst [vmem:[%s294_s17] sm:$0xff] %v610_v8  ;;  %613 = vst [vmem:[%s294_s17 + $0x8] sm:$0xff] %v611_v9 }
 0x640   : > { %835 = shalt.err (!%p832_p4)
}
 0x641   : > { %s836_s8 = scalar_lea.hbm %s1102_s19, 256  ;;  %s840_s22 = scalar_lea.hbm %s1153_s7, 512 }
 0x642   : > { %p837_p5 = scmp.ne.s32.totalorder %s1102_s19, %s836_s8  ;;  %p841_p0 = scmp.lt.u32.totalorder %s1102_s19, %s1153_s7 }
 0x643   : > { %p842_p1 = scmp.lt.u32.totalorder %s840_s22, %s836_s8  ;;  %p844_p6 = scmp.lt.u32.totalorder %s836_s8, %s1102_s19 }
 0x644   : > { %p838_p8 = pnand %p837_p5, %p1162_p11 }
 0x645   : > { %p843_p3 = por %p842_p1, %p841_p0 }
 0x646   : > { %p839_p9 = pneg %p838_p8 }
 0x647   : > { %p845_p12 = por %p844_p6, %p843_p3 }
 0x649   : > { %p846_p13 = pnand %p845_p12, %p839_p9 }
 0x64b   : > { %849 = shalt.err (!%p846_p13)
}
 0x64c   : > { %742 = dma.vmem_to_hbm [thread:$0]  (%p1162_p11), %s1104_s12, 256, %s1102_s19, %s615_s28  }
 0x64d PF: > { %s641_s18 = sand.u32 1, %s876_s24   ;;  %p1163_p7 = scmp.ne.s32.totalorder %s1158_s14, 0 }
 0x64e   : > { %p1164_p10 = scmp.ge.s32.totalorder %s888_s27, 2  ;;  %s642_s15 = scalar_lea.sflag [#allocation4], %s641_s18 }
 0x650   : > { %p749_p2 = pnand %p1164_p10, %p1163_p7 }
 0x652   : > { %871 = dma.done.wait (!%p749_p2), %s642_s15, 256  }
 0x653   : > { %873 = vsyncadd (!%p749_p2), %s642_s15, 4294967040  ;;  %p20_p4 = scmp.ge.s32.totalorder %s959_s30, 4   ;;  %s1165_s24 = smov %s880_s25 }
 0x654   : > { %s1166_s25 = smov %s884_s26  ;;  %s1167_s26 = smov %s971_s10 }
 0x655   : > { %s1168_s27 = smov %s959_s30  ;;  %22 = sbr.rel (!%p20_p4) target bundleno = 5 (0x5), region = 93 }
 0x65c   :  { %647 = vsyncpa [#allocation3], 1 }
 0x65d   :  { %649 = vsyncpa [#allocation3 + $0x1], 1 }
 0x65e   :  { %650 = vsyncpa [#allocation4], 1 }
 0x65f   :  { %652 = vsyncpa [#allocation4 + $0x1], 1 }

</bundles_post_ra>
